<compile_context>
chip_gen: v6e
topology: v6e:2x2x1
jax: 0.10.0
libtpu: 0.0.40
codegen_flags: <defaults>
</compile_context>

<pallas_src>
import math

import jax
import jax.numpy as jnp
from jax.experimental import pallas as pl
from jax.experimental.pallas import tpu as pltpu


def make_positional_encoding(d_model: int, max_len: int = 512) -> jnp.ndarray:
    """Deterministic buffer identical to the PyTorch __init__ (shape (max_len, d_model))."""
    position = jnp.arange(0, max_len, dtype=jnp.float32)[:, None]            # (max_len, 1)
    div_term = jnp.exp(
        jnp.arange(0, d_model, 2, dtype=jnp.float32) * -(math.log(10000.0) / d_model)
    )                                                                         # (d_model//2,)
    angles = position * div_term                                              # (max_len, d_model//2)
    pe = jnp.zeros((max_len, d_model), dtype=jnp.float32)
    pe = pe.at[:, 0::2].set(jnp.sin(angles))
    pe = pe.at[:, 1::2].set(jnp.cos(angles))
    return pe


def _pe_add_kernel(x_ref, pe_ref, o_ref):
    # x_ref: (Bb, Ln) tile, pe_ref: (1, Ln) tile -> broadcast over sublanes,
    # one VPU add per vreg, no layout shuffling.
    o_ref[...] = x_ref[...] + pe_ref[...]


_LANE = 128
_MIN_PALLAS_BYTES = 1 << 20       # below this, plain JAX (fused by XLA) is faster
_SPLIT_BYTES = 256 * 1024         # only split a 1x1 grid above this (2-TC v7x)


def _sublane_granularity(itemsize: int) -> int:
    """Packed sublane granularity: f32 -> 8 rows, bf16 -> 16, int8/fp8 -> 32."""
    return max(8, (8 * 4) // max(1, itemsize))


def _target_block_bytes() -> int:
    """Per-generation x-block budget (2 MiB is the measured ~85%-roofline plateau)."""
    try:
        kind = jax.devices()[0].device_kind.lower()
    except Exception:
        return 2 << 20
    # v6e: 128 MiB VMEM / 32 MiB scoped default -> room for 4 MiB blocks.
    # v5e (16 MiB scoped default) and v7x (64 MiB physical) stay at 2 MiB.
    return (4 << 20) if "v6" in kind else (2 << 20)


def _choose_tiles(B: int, N: int, itemsize: int, target_bytes: int):
    """Pick (batch_tile, lane_tile) for the flattened (B, N) view, never exceeding budget."""
    sub = _sublane_granularity(itemsize)
    target_elems = max(_LANE, target_bytes // itemsize)

    # Minimum batch tile we will ever pick (full B if B <= sub, else sub rows).
    bb_floor = B if B <= sub else sub

    # Lane tile: full N if it fits alongside the minimum batch tile, otherwise
    # the largest multiple of 128 within budget, preferring a divisor of N so
    # every tile/store is full-width and unmasked.
    ln_budget = max(_LANE, target_elems // bb_floor)
    if N <= ln_budget:
        ln = N
    else:
        ln = 0
        cand = (ln_budget // _LANE) * _LANE
        while cand >= _LANE:
            if N % cand == 0:
                ln = cand
                break
            cand -= _LANE
        if ln == 0:
            ln = max(_LANE, (ln_budget // _LANE) * _LANE)

    # Batch tile: as many rows of `ln` as fit the budget, rounded to the packed
    # sublane granularity (or the full batch dim).
    rows = max(1, target_elems // ln)
    if rows >= B:
        bb = B
    else:
        bb = max(bb_floor, (rows // sub) * sub)

    # v7x has 2 TensorCores: make sure a large 1x1 grid can still be sharded.
    if (pl.cdiv(B, bb) * pl.cdiv(N, ln) == 1
            and B * N * itemsize >= _SPLIT_BYTES
            and N >= 2 * _LANE):
        ln = max(_LANE, (N // 2 // _LANE) * _LANE)

    assert bb * ln * itemsize <= target_bytes, "tile budget overshoot"
    assert (bb % 8 == 0) or (bb == B), "batch tile violates (8,128) rule"
    assert (ln % _LANE == 0) or (ln == N), "lane tile violates (8,128) rule"
    return bb, ln


def positional_encoding_forward(x: jnp.ndarray, pe: jnp.ndarray,
                                *, force_pallas: bool = False) -> jnp.ndarray:
    """x: (B, T, D); pe: (max_len, D). Returns x + pe[:T] broadcast over batch."""
    B, T, D = x.shape
    N = T * D
    itemsize = jnp.dtype(x.dtype).itemsize

    # Cast pe once in the wrapper (halves pe HBM traffic for bf16 x).
    pe_slice = pe[:T, :].astype(x.dtype)

    # Tiny inputs: fixed pallas_call/DMA setup overhead dwarfs the data movement.
    if not force_pallas and B * N * itemsize < _MIN_PALLAS_BYTES:
        return x + pe_slice[None, :, :]

    x2 = x.reshape(B, N)
    pe2 = pe_slice.reshape(1, N)

    target_bytes = _target_block_bytes()
    bb, ln = _choose_tiles(B, N, itemsize, target_bytes)

    # Batch is the innermost grid axis: the pe block index (0, j) is unchanged
    # across consecutive steps, so Pallas issues its DMA once per lane tile
    # instead of once per grid step.
    grid = (pl.cdiv(N, ln), pl.cdiv(B, bb))

    # Deterministic VMEM budget: double-buffered x in + out + pe, plus headroom.
    footprint = (4 * bb * ln + 2 * ln) * itemsize
    vmem_limit = min(max(footprint * 5 // 4 + (1 << 20), 8 << 20), 64 << 20)

    out2 = pl.pallas_call(
        _pe_add_kernel,
        out_shape=jax.ShapeDtypeStruct((B, N), x.dtype),
        grid=grid,
        in_specs=[
            pl.BlockSpec((bb, ln), lambda j, i: (i, j)),
            pl.BlockSpec((1, ln), lambda j, i: (0, j)),   # tracks lane tile only
        ],
        out_specs=pl.BlockSpec((bb, ln), lambda j, i: (i, j)),
        compiler_params=pltpu.CompilerParams(
            dimension_semantics=("parallel", "parallel"),
            vmem_limit_bytes=int(vmem_limit),
        ),
        cost_estimate=pl.CostEstimate(
            flops=B * N,
            transcendentals=0,
            bytes_accessed=(2 * B * N + N) * itemsize,
        ),
    )(x2, pe2)

    return out2.reshape(B, T, D)


if __name__ == "__main__":
    # Module defaults: d_model=32, max_len=512.
    pe32 = make_positional_encoding(d_model=32, max_len=512)

    # 1) Small f32 case (batch=2, seq=8, d_model=32) routed through the kernel.
    B, T, D = 2, 8, 32
    x = jax.random.normal(jax.random.PRNGKey(0), (B, T, D), dtype=jnp.float32)
    out = jax.block_until_ready(positional_encoding_forward(x, pe32, force_pallas=True))
    ref = x + pe32[:T, :][None, :, :]
    assert out.shape == (B, T, D)
    assert jnp.allclose(out, ref, atol=1e-6), "f32 mismatch vs reference"

    # 2) bf16 case (exercises dtype-aware sublane tiling; pe added in bf16,
    #    matching the kernel's wrapper-side cast).
    xb = jax.random.normal(jax.random.PRNGKey(1), (4, 16, 32), dtype=jnp.bfloat16)
    outb = jax.block_until_ready(positional_encoding_forward(xb, pe32, force_pallas=True))
    refb = xb + pe32[:16, :].astype(jnp.bfloat16)[None, :, :]
    assert jnp.allclose(outb.astype(jnp.float32), refb.astype(jnp.float32),
                        atol=1e-2), "bf16 mismatch vs reference"

    # 3) Tiny-shape fast path (plain JAX fallback) sanity.
    outf = jax.block_until_ready(positional_encoding_forward(x, pe32))
    assert jnp.allclose(outf, ref, atol=1e-6), "fallback mismatch vs reference"

    print("KERNEL_OK")
</pallas_src>

<mosaic_0001>
module attributes {stable_mosaic.version = 11 : i64} {
  func.func @_pe_add_kernel(%arg0: i32, %arg1: i32, %arg2: memref<2x256xf32, #tpu.memory_space<vmem>>, %arg3: memref<1x256xf32, #tpu.memory_space<vmem>>, %arg4: memref<2x256xf32, #tpu.memory_space<vmem>>) attributes {dimension_semantics = [#tpu.dimension_semantics<parallel>, #tpu.dimension_semantics<parallel>], iteration_bounds = array<i64: 1, 1>, scalar_prefetch = 0 : i64, scratch_operands = 0 : i64, tpu.core_type = #tpu.core_type<tc>, window_params = [{transform_indices = @transform_0, window_bounds = array<i64: 2, 256>}, {transform_indices = @transform_1, window_bounds = array<i64: 1, 256>}, {transform_indices = @transform_2, window_bounds = array<i64: 2, 256>}]} {
    %c0 = arith.constant 0 : index
    %c0_0 = arith.constant 0 : index
    %0 = vector.load %arg2[%c0, %c0_0] : memref<2x256xf32, #tpu.memory_space<vmem>>, vector<2x256xf32>
    %c0_1 = arith.constant 0 : index
    %c0_2 = arith.constant 0 : index
    %1 = vector.load %arg3[%c0_1, %c0_2] : memref<1x256xf32, #tpu.memory_space<vmem>>, vector<1x256xf32>
    %2 = vector.broadcast %1 : vector<1x256xf32> to vector<2x256xf32>
    %3 = arith.addf %0, %2 : vector<2x256xf32>
    %c0_3 = arith.constant 0 : index
    %c0_4 = arith.constant 0 : index
    %4 = vector.load %arg4[%c0_3, %c0_4] : memref<2x256xf32, #tpu.memory_space<vmem>>, vector<2x256xf32>
    tpu.vector_store %arg4[%c0_3, %c0_4], %3 {strides = array<i32>} : memref<2x256xf32, #tpu.memory_space<vmem>>, vector<2x256xf32>,
    return
  }
  func.func @transform_0(%arg0: i32, %arg1: i32) -> (i32, i32) {
    %c0_i32 = arith.constant 0 : i32
    return %arg1, %arg0 : i32, i32
  }
  func.func @transform_1(%arg0: i32, %arg1: i32) -> (i32, i32) {
    %c0_i32 = arith.constant 0 : i32
    %c0_i32_0 = arith.constant 0 : i32
    return %c0_i32, %arg0 : i32, i32
  }
  func.func @transform_2(%arg0: i32, %arg1: i32) -> (i32, i32) {
    %c0_i32 = arith.constant 0 : i32
    return %arg1, %arg0 : i32, i32
  }
}

</mosaic_0001>

<bundles_post_ra>
// kernel: tpu_custom_call.1
= control target key start
LH: loop header
LB: loop body
LE: loop exit
PB: predicated region body
PF: predicated region fallthrough
CT: control target
= control target key end

     0   :  { %7 = vsyncpa [#allocation3], 0  ;;  %s172_s0 = inlined_call_operand.hbm [shape: f32[2,256], index: 0, kind: input, shape index: {}]   ;;  %s173_s1 = inlined_call_operand.hbm [shape: f32[1,256], index: 1, kind: input, shape index: {}]   ;;  %s174_s2 = inlined_call_operand.hbm [shape: f32[2,256], index: 2, kind: output, shape index: {}]  }
   0x1   :  { %8 = vsyncpa [#allocation6], 0 }
   0x2   :  { %9 = vsyncpa [#allocation4], 0  ;;  %s144_s9 = smov [#allocation2]   ;;  %s145_s11 = smov [#allocation5]  }
   0x3   :  { %s16_s10 = sshll.u32 %s144_s9, 4  ;;  %s26_s12 = sshll.u32 %s145_s11, 4  ;;  %s17_s10 = int_to_ptr.vmem [resolvable:$true] %s16_s10  ;;  %s27_s12 = int_to_ptr.vmem [resolvable:$true] %s26_s12 }
   0x4   :  { %s86_s13 = scalar_lea.vmem %s17_s10, 64  ;;  %p91_p1 = scmp.lt.s32.totalorder %s17_s10, %s17_s10 }
   0x5   :  { %p87_p0 = scmp.ne.s32.totalorder %s17_s10, %s86_s13  ;;  %p92_p2 = scmp.lt.s32.totalorder %s86_s13, %s86_s13 }
   0x7   :  { %p93_p3 = por %p92_p2, %p91_p1 }
   0x9   :  { %p94_p4 = pnand %p93_p3, %p87_p0 }
   0xb   :  { %97 = shalt.err (!%p94_p4)
}
   0xc   :  { %19 = dma.hbm_to_vmem [thread:$0]  %s172_s0, 64, %s17_s10, [#allocation3]  }
   0xd   :  { %s106_s16 = scalar_lea.vmem %s27_s12, 32  ;;  %p111_p6 = scmp.lt.s32.totalorder %s27_s12, %s27_s12 }
   0xe   :  { %p107_p5 = scmp.ne.s32.totalorder %s27_s12, %s106_s16  ;;  %p112_p7 = scmp.lt.s32.totalorder %s106_s16, %s106_s16 }
  0x10   :  { %p113_p8 = por %p112_p7, %p111_p6 }
  0x12   :  { %p114_p9 = pnand %p113_p8, %p107_p5 }
  0x14   :  { %117 = shalt.err (!%p114_p9)
}
  0x15   :  { %29 = dma.hbm_to_vmem [thread:$0]  %s173_s1, 32, %s27_s12, [#allocation6]  }
  0x16   :  { %138 = dma.done.wait [#allocation3], 64  }
  0x17   :  { %139 = vsyncadd [#allocation3], 4294967232 }
  0x18   :  { %140 = dma.done.wait [#allocation6], 32  }
  0x19   :  { %141 = vsyncadd [#allocation6], 4294967264  ;;  %v39_v0 = vlaneseq  ;;  %v146_v1 = vmov 1983009808   ;;  %v37_v7 = vld [vmem:[#allocation5] sm:$0x3] }
  0x1a   :  { %v49_v2 = vunpack.c.l.s4 %v146_v1  ;;  %v36_v12 = vld [vmem:[#allocation2] sm:$0xf]  ;;  %s147_s0 = smov [#allocation7]  }
  0x1b   :  { %v40_v3 = vshrl.u32 %v39_v0, 7  ;;  %s64_s19 = sshll.u32 %s147_s0, 4  ;;  %s65_s19 = int_to_ptr.vmem [resolvable:$true] %s64_s19 }
  0x1c   :  { %v50_v6 = vunpack.c.0.s8 %v49_v2  ;;  %s118_s1 = scalar_lea.vmem %s65_s19, 64  ;;  %p123_p11 = scmp.lt.s32.totalorder %s65_s19, %s65_s19 }
  0x1d   :  { %v41_v4 = vsub.s32 0, %v40_v3  ;;  %v45_v5 = vsub.s32 1, %v40_v3  ;;  %p119_p10 = scmp.ne.s32.totalorder %s65_s19, %s118_s1  ;;  %p124_p12 = scmp.lt.s32.totalorder %s118_s1, %s118_s1 }
  0x1e   :  { %v53_v10 = vsub.s32 %v50_v6, %v40_v3 }
  0x1f   :  { %v42_v8 = vrot.slane %v37_v7, %v41_v4  ;;  %v46_v9 = vrot.slane %v37_v7, %v45_v5  ;;  %p125_p13 = por %p124_p12, %p123_p11 }
  0x21   :  { %v47_v11 = vcombine.low %v42_v8, %v46_v9  ;;  %p126_p0 = pnand %p125_p13, %p119_p10 }
  0x23   :  { %v54_v13 = vrot.slane %v47_v11, %v53_v10 }
  0x25   :  { %v56_v14 = vadd.f32 %v54_v13, %v36_v12 }
  0x27   :  { %57 = vst [vmem:[#allocation7] sm:$0xf] %v56_v14 }
  0x28   :  { %129 = shalt.err (!%p126_p0)
}
  0x29   :  { %67 = dma.vmem_to_hbm [thread:$0]  %s65_s19, 64, %s174_s2, [#allocation4]  }
  0x2a   :  { %142 = dma.done.wait [#allocation4], 64  }
  0x2b   :  { %143 = vsyncadd [#allocation4], 4294967232 }
  0x2c   :  { %71 = vsyncpa [#allocation3], 1 }
  0x2d   :  { %72 = vsyncpa [#allocation6], 1 }
  0x2e   :  { %73 = vsyncpa [#allocation4], 1 }

</bundles_post_ra>
